<compile_context>
chip_gen: v7x
topology: tpu7x:2x2x1
jax: 0.10.0
libtpu: 0.0.40
codegen_flags: <defaults>
</compile_context>

<pallas_src>
import math
import functools

import jax
import jax.numpy as jnp
import numpy as np
from jax import lax
from jax.experimental import pallas as pl
from jax.experimental.pallas import tpu as pltpu

# ---------------- configuration (small, consistent with the module) ----------
D_MODEL = 32
N_HEAD = 4
HEAD_DIM = D_MODEL // N_HEAD
SEQ = 8
BATCH = 2
LN_EPS = 1e-5


# ---------------- packed constants slab layout --------------------------------
def _slab_layout(d, r, n_head):
    """Row offsets (multiples of 8) for the single packed f32 constants slab."""
    j = n_head * r
    up8 = lambda v: -(-v // 8) * 8
    rows_per_entry = [
        ("w_qkv", d),        # (d, 3d)   LN1-folded, Q-scaled, (K,N) layout
        ("w_fc", d),         # (d, 4d)   LN2-folded, (K,N)
        ("w_pr", 4 * d),     # (4d, d)   (K,N)
        ("w_o", d),          # (d, d)    (K,N)
        ("bias", 4),         # row 0: b_qkv(3d)  1: b_fc(4d)  2: b_o(d)  3: b_pr(d)
        ("h_mask", j),       # (j, d)    head block mask (0/1)
        ("b_bias", r),       # (r, j)    cross-batch additive mask (0 / -1e30)
    ]
    off, cur = {}, 0
    for name, rows in rows_per_entry:
        off[name] = cur
        cur += up8(rows)
    lanes = -(-max(4 * d, 3 * d, j, 128) // 128) * 128
    return off, cur, lanes


def _build_const_slab(params, S, B):
    """Fold LN affines + attention scale into the weights and pack everything
    (weights, biases, static masks) into one (rows, 128) f32 slab."""
    d, hd, nh = D_MODEL, HEAD_DIM, N_HEAD
    r, j = S * B, N_HEAD * S * B
    off, rows, lanes = _slab_layout(d, r, nh)
    scale = 1.0 / math.sqrt(hd)

    g1, be1 = params["ln1_g"][0], params["ln1_b"][0]          # (d,)
    g2, be2 = params["ln2_g"][0], params["ln2_b"][0]

    w_qkv_t = params["w_qkv"].T                               # (d, 3d) (K,N)
    w_qkv_f = g1[:, None] * w_qkv_t                           # fold LN1 gamma
    b_qkv_f = be1 @ w_qkv_t + params["b_qkv"][0]              # fold LN1 beta
    qsel = np.concatenate([np.full(d, scale, np.float32),     # fold 1/sqrt(hd)
                           np.ones(2 * d, np.float32)])
    w_qkv_f = w_qkv_f * qsel[None, :]
    b_qkv_f = b_qkv_f * qsel

    w_fc_t = params["w_fc"].T                                 # (d, 4d)
    w_fc_f = g2[:, None] * w_fc_t                             # fold LN2 gamma
    b_fc_f = be2 @ w_fc_t + params["b_fc"][0]                 # fold LN2 beta

    w_pr_t = params["w_pr"].T                                 # (4d, d)
    w_o_t = params["w_o"].T                                   # (d, d)

    # Static masks (numpy -> XLA constants, folded at compile time).
    jj, dd, rr = np.arange(j), np.arange(d), np.arange(r)
    # head_mask[row, col] = 1 iff packed row's head == col's head slice
    h_mask = (jj[:, None] // r == dd[None, :] // hd).astype(np.float32)
    # rows are seq-major (row = s*B + b) => batch(row) = row % B; same for keys
    b_bias = np.where((rr[:, None] % B) == ((jj[None, :] % r) % B),
                      0.0, -1e30).astype(np.float32)

    slab = jnp.zeros((rows, lanes), jnp.float32)
    slab = slab.at[off["w_qkv"]:off["w_qkv"] + d, :3 * d].set(w_qkv_f)
    slab = slab.at[off["w_fc"]:off["w_fc"] + d, :4 * d].set(w_fc_f)
    slab = slab.at[off["w_pr"]:off["w_pr"] + 4 * d, :d].set(w_pr_t)
    slab = slab.at[off["w_o"]:off["w_o"] + d, :d].set(w_o_t)
    slab = slab.at[off["bias"] + 0, :3 * d].set(b_qkv_f)
    slab = slab.at[off["bias"] + 1, :4 * d].set(b_fc_f)
    slab = slab.at[off["bias"] + 2, :d].set(params["b_o"][0])
    slab = slab.at[off["bias"] + 3, :d].set(params["b_pr"][0])
    slab = slab.at[off["h_mask"]:off["h_mask"] + j, :d].set(jnp.asarray(h_mask))
    slab = slab.at[off["b_bias"]:off["b_bias"] + r, :j].set(jnp.asarray(b_bias))
    return slab


# ---------------- kernel -------------------------------------------------------
def residual_attention_block_kernel(x_ref, c_ref, o_ref, *, n_head):
    R, D = x_ref.shape                 # R = S*B token rows (seq-major)
    J = n_head * R                     # packed (head, key-row) axis
    D3, D4 = 3 * D, 4 * D
    off, _, _ = _slab_layout(D, R, n_head)
    f32, bf16 = jnp.float32, jnp.bfloat16

    def ln(v):  # unit-affine LayerNorm (gamma/beta folded into the weights)
        mu = jnp.mean(v, axis=-1, keepdims=True)
        var = jnp.mean(jnp.square(v - mu), axis=-1, keepdims=True)
        return (v - mu) * lax.rsqrt(var + LN_EPS)

    x = x_ref[...]                                             # (R, D) f32

    # ------------------------- attention branch -----------------------------
    h = ln(x)
    w_qkv = c_ref[off["w_qkv"]:off["w_qkv"] + D, 0:D3]
    b_qkv = c_ref[off["bias"] + 0:off["bias"] + 1, 0:D3]
    qkv = jnp.dot(h.astype(bf16), w_qkv.astype(bf16),
                  preferred_element_type=f32) + b_qkv          # (R, 3D)
    q = qkv[:, 0:D]                    # Q scale already folded into the weight
    k = qkv[:, D:2 * D]
    v = qkv[:, 2 * D:D3]

    # Fused multi-head attention: replicate K/V once per head along sublanes
    # and zero every feature column outside that head's slice; one q @ k_rep^T
    # MXU pass yields all (head, query, key) scores, one p @ v_rep pass
    # scatters every head's context back into its own feature columns.
    head_mask = c_ref[off["h_mask"]:off["h_mask"] + J, 0:D]    # (J, D) 0/1
    k_rep = (jnp.tile(k, (n_head, 1)) * head_mask).astype(bf16)
    v_rep = (jnp.tile(v, (n_head, 1)) * head_mask).astype(bf16)

    s = lax.dot_general(q.astype(bf16), k_rep, (((1,), (1,)), ((), ())),
                        preferred_element_type=f32)            # (R, J)
    s = s + c_ref[off["b_bias"]:off["b_bias"] + R, 0:J]        # cross-batch mask
    # Global row max is a valid stabilizer (constant per row => per head block).
    s = s - jnp.max(s, axis=-1, keepdims=True)
    p = jnp.exp(s).astype(bf16)                                # (R, J)

    ctx = jnp.dot(p, v_rep, preferred_element_type=f32)        # (R, D) numerator
    # p @ head_mask = per-head softmax sums, already broadcast over that head's
    # feature columns (same rounding as the numerator -> errors cancel).
    den = jnp.dot(p, head_mask.astype(bf16), preferred_element_type=f32)
    ctx = ctx * pl.reciprocal(jnp.maximum(den, 1e-30), approx=True)

    w_o = c_ref[off["w_o"]:off["w_o"] + D, 0:D]
    b_o = c_ref[off["bias"] + 2:off["bias"] + 3, 0:D]
    attn = jnp.dot(ctx.astype(bf16), w_o.astype(bf16),
                   preferred_element_type=f32) + b_o
    x = x + attn

    # --------------------------- MLP branch ---------------------------------
    h2 = ln(x)
    w_fc = c_ref[off["w_fc"]:off["w_fc"] + D, 0:D4]
    b_fc = c_ref[off["bias"] + 1:off["bias"] + 2, 0:D4]
    f = jnp.dot(h2.astype(bf16), w_fc.astype(bf16),
                preferred_element_type=f32) + b_fc             # (R, 4D)
    f = f * jax.nn.sigmoid(1.702 * f)                          # QuickGELU
    w_pr = c_ref[off["w_pr"]:off["w_pr"] + D4, 0:D]
    b_pr = c_ref[off["bias"] + 3:off["bias"] + 4, 0:D]
    out = jnp.dot(f.astype(bf16), w_pr.astype(bf16),
                  preferred_element_type=f32) + b_pr           # (R, D)

    o_ref[...] = x + out


@jax.jit
def residual_attention_block(x_sbd, params):
    """x_sbd: (S, B, D) float32 (PyTorch seq-first layout). Returns same."""
    S, B, D = x_sbd.shape
    x2 = x_sbd.reshape(S * B, D)              # seq-major rows; no transpose
    slab = _build_const_slab(params, S, B)    # one packed constants operand

    kernel = functools.partial(residual_attention_block_kernel, n_head=N_HEAD)
    vmem = pl.BlockSpec(memory_space=pltpu.MemorySpace.VMEM)
    out = pl.pallas_call(
        kernel,
        out_shape=jax.ShapeDtypeStruct((S * B, D), jnp.float32),
        in_specs=[vmem, vmem],
        out_specs=vmem,
    )(x2, slab)
    return out.reshape(S, B, D)


# ---------------- pure-JAX reference (for correctness check) ----------------
def _layernorm_ref(v, gamma, beta):
    mu = jnp.mean(v, axis=-1, keepdims=True)
    var = jnp.mean(jnp.square(v - mu), axis=-1, keepdims=True)
    return (v - mu) * lax.rsqrt(var + LN_EPS) * gamma + beta


def reference_forward(x_sbd, params):
    S, B, D = x_sbd.shape
    x = jnp.transpose(x_sbd, (1, 0, 2))  # (B, S, D)

    h = _layernorm_ref(x, params["ln1_g"][0], params["ln1_b"][0])
    qkv = jnp.einsum("bsd,ed->bse", h, params["w_qkv"]) + params["b_qkv"][0]
    q, k, v = jnp.split(qkv, 3, axis=-1)

    def split_heads(t):  # (B,S,D) -> (B,H,S,hd)
        return t.reshape(B, S, N_HEAD, HEAD_DIM).transpose(0, 2, 1, 3)

    qh, kh, vh = split_heads(q), split_heads(k), split_heads(v)
    s = jnp.einsum("bhqd,bhkd->bhqk", qh, kh) / math.sqrt(HEAD_DIM)
    p = jax.nn.softmax(s, axis=-1)
    o = jnp.einsum("bhqk,bhkd->bhqd", p, vh)
    o = o.transpose(0, 2, 1, 3).reshape(B, S, D)
    attn = jnp.einsum("bsd,ed->bse", o, params["w_o"]) + params["b_o"][0]

    x = x + attn
    h2 = _layernorm_ref(x, params["ln2_g"][0], params["ln2_b"][0])
    f = jnp.einsum("bsd,ed->bse", h2, params["w_fc"]) + params["b_fc"][0]
    f = f * jax.nn.sigmoid(1.702 * f)
    f = jnp.einsum("bse,de->bsd", f, params["w_pr"]) + params["b_pr"][0]
    return jnp.transpose(x + f, (1, 0, 2))


def init_params(key, d=D_MODEL):
    ks = jax.random.split(key, 12)
    n = lambda k, shape, s: (s * jax.random.normal(k, shape)).astype(jnp.float32)
    return {
        "ln1_g": (1.0 + 0.1 * jax.random.normal(ks[0], (1, d))).astype(jnp.float32),
        "ln1_b": n(ks[1], (1, d), 0.05),
        "w_qkv": n(ks[2], (3 * d, d), 0.05),
        "b_qkv": n(ks[3], (1, 3 * d), 0.02),
        "w_o":   n(ks[4], (d, d), 0.05),
        "b_o":   n(ks[5], (1, d), 0.02),
        "ln2_g": (1.0 + 0.1 * jax.random.normal(ks[6], (1, d))).astype(jnp.float32),
        "ln2_b": n(ks[7], (1, d), 0.05),
        "w_fc":  n(ks[8], (4 * d, d), 0.05),
        "b_fc":  n(ks[9], (1, 4 * d), 0.02),
        "w_pr":  n(ks[10], (d, 4 * d), 0.05),
        "b_pr":  n(ks[11], (1, d), 0.02),
    }


if __name__ == "__main__":
    key = jax.random.PRNGKey(0)
    kx, kp = jax.random.split(key)
    # layout: (S, B, D) — seq-first, matching PyTorch nn.MultiheadAttention.
    x = jax.random.normal(kx, (SEQ, BATCH, D_MODEL), dtype=jnp.float32)
    params = init_params(kp)

    out = jax.block_until_ready(residual_attention_block(x, params))
    ref = jax.block_until_ready(reference_forward(x, params))

    # Tolerance 2e-2: matmul operands are bfloat16 (per the perf review the
    # expected relative error is ~1e-2); observed error is a few e-3, and the
    # EUP approximate reciprocal in the softmax adds ~1e-4.
    np.testing.assert_allclose(np.asarray(out), np.asarray(ref),
                               rtol=2e-2, atol=2e-2)
    assert out.shape == (SEQ, BATCH, D_MODEL) and out.dtype == jnp.float32
    print("KERNEL_OK")
</pallas_src>

<mosaic_0001>
module attributes {stable_mosaic.version = 11 : i64} {
  func.func @residual_attention_block_kernel(%arg0: memref<16x32xf32, #tpu.memory_space<vmem>>, %arg1: memref<312x128xf32, #tpu.memory_space<vmem>>, %arg2: memref<16x32xf32, #tpu.memory_space<vmem>>) attributes {dimension_semantics = [], scalar_prefetch = 0 : i64, scratch_operands = 0 : i64, tpu.core_type = #tpu.core_type<tc>} {
    %c0 = arith.constant 0 : index
    %c0_0 = arith.constant 0 : index
    %0 = vector.load %arg0[%c0, %c0_0] : memref<16x32xf32, #tpu.memory_space<vmem>>, vector<16x32xf32>
    %cst = arith.constant dense<0.000000e+00> : vector<16xf32>
    %1 = vector.multi_reduction <add>, %0, %cst [1] : vector<16x32xf32> to vector<16xf32>
    %2 = vector.shape_cast %1 : vector<16xf32> to vector<16x1xf32>
    %cst_1 = arith.constant 3.200000e+01 : f32
    %3 = vector.broadcast %cst_1 : f32 to vector<16x1xf32>
    %4 = arith.divf %2, %3 : vector<16x1xf32>
    %5 = vector.broadcast %4 : vector<16x1xf32> to vector<16x32xf32>
    %6 = arith.subf %0, %5 : vector<16x32xf32>
    %7 = arith.mulf %6, %6 : vector<16x32xf32>
    %cst_2 = arith.constant dense<0.000000e+00> : vector<16xf32>
    %8 = vector.multi_reduction <add>, %7, %cst_2 [1] : vector<16x32xf32> to vector<16xf32>
    %9 = vector.shape_cast %8 : vector<16xf32> to vector<16x1xf32>
    %cst_3 = arith.constant 3.200000e+01 : f32
    %10 = vector.broadcast %cst_3 : f32 to vector<16x1xf32>
    %11 = arith.divf %9, %10 : vector<16x1xf32>
    %12 = vector.broadcast %4 : vector<16x1xf32> to vector<16x32xf32>
    %13 = arith.subf %0, %12 : vector<16x32xf32>
    %cst_4 = arith.constant 9.99999974E-6 : f32
    %14 = vector.broadcast %cst_4 : f32 to vector<16x1xf32>
    %15 = arith.addf %11, %14 : vector<16x1xf32>
    %16 = math.rsqrt %15 : vector<16x1xf32>
    %17 = vector.broadcast %16 : vector<16x1xf32> to vector<16x32xf32>
    %18 = arith.mulf %13, %17 : vector<16x32xf32>
    %c0_5 = arith.constant 0 : index
    %c0_6 = arith.constant 0 : index
    %19 = vector.load %arg1[%c0_5, %c0_6] : memref<312x128xf32, #tpu.memory_space<vmem>>, vector<32x96xf32>
    %c224 = arith.constant 224 : index
    %c0_7 = arith.constant 0 : index
    %20 = vector.load %arg1[%c224, %c0_7] : memref<312x128xf32, #tpu.memory_space<vmem>>, vector<1x96xf32>
    %21 = arith.truncf %18 : vector<16x32xf32> to vector<16x32xbf16>
    %22 = arith.truncf %19 : vector<32x96xf32> to vector<32x96xbf16>
    %cst_8 = arith.constant dense<0.000000e+00> : vector<16x96xf32>
    %23 = tpu.matmul %21, %22, %cst_8 {dimension_numbers = #tpu.dot_dimension_numbers<[1], [0], [0], [1], [0, 0, 1, 1], [], []>} : vector<16x32xbf16>, vector<32x96xbf16>, vector<16x96xf32> -> vector<16x96xf32>
    %24 = vector.broadcast %20 : vector<1x96xf32> to vector<16x96xf32>
    %25 = arith.addf %23, %24 : vector<16x96xf32>
    %26 = vector.extract_strided_slice %25 {offsets = [0, 0], sizes = [16, 32], strides = [1, 1]} : vector<16x96xf32> to vector<16x32xf32>
    %27 = vector.extract_strided_slice %25 {offsets = [0, 32], sizes = [16, 32], strides = [1, 1]} : vector<16x96xf32> to vector<16x32xf32>
    %28 = vector.extract_strided_slice %25 {offsets = [0, 64], sizes = [16, 32], strides = [1, 1]} : vector<16x96xf32> to vector<16x32xf32>
    %c232 = arith.constant 232 : index
    %c0_9 = arith.constant 0 : index
    %29 = vector.load %arg1[%c232, %c0_9] : memref<312x128xf32, #tpu.memory_space<vmem>>, vector<64x32xf32>
    %30 = tpu.concatenate %27, %27, %27, %27 in 0 : vector<16x32xf32>, vector<16x32xf32>, vector<16x32xf32>, vector<16x32xf32> -> vector<64x32xf32>
    %31 = arith.mulf %30, %29 : vector<64x32xf32>
    %32 = arith.truncf %31 : vector<64x32xf32> to vector<64x32xbf16>
    %33 = tpu.concatenate %28, %28, %28, %28 in 0 : vector<16x32xf32>, vector<16x32xf32>, vector<16x32xf32>, vector<16x32xf32> -> vector<64x32xf32>
    %34 = arith.mulf %33, %29 : vector<64x32xf32>
    %35 = arith.truncf %34 : vector<64x32xf32> to vector<64x32xbf16>
    %36 = arith.truncf %26 : vector<16x32xf32> to vector<16x32xbf16>
    %cst_10 = arith.constant dense<0.000000e+00> : vector<16x64xf32>
    %37 = tpu.matmul %36, %32, %cst_10 {dimension_numbers = #tpu.dot_dimension_numbers<[1], [1], [0], [0], [0, 0, 1, 0], [], []>} : vector<16x32xbf16>, vector<64x32xbf16>, vector<16x64xf32> -> vector<16x64xf32>
    %c296 = arith.constant 296 : index
    %c0_11 = arith.constant 0 : index
    %38 = vector.load %arg1[%c296, %c0_11] : memref<312x128xf32, #tpu.memory_space<vmem>>, vector<16x64xf32>
    %39 = arith.addf %37, %38 : vector<16x64xf32>
    %cst_12 = arith.constant dense<0xFF800000> : vector<16xf32>
    %40 = vector.multi_reduction <maximumf>, %39, %cst_12 [1] : vector<16x64xf32> to vector<16xf32>
    %41 = vector.shape_cast %40 : vector<16xf32> to vector<16x1xf32>
    %42 = vector.broadcast %41 : vector<16x1xf32> to vector<16x64xf32>
    %43 = arith.subf %39, %42 : vector<16x64xf32>
    %44 = math.exp %43 : vector<16x64xf32>
    %45 = arith.truncf %44 : vector<16x64xf32> to vector<16x64xbf16>
    %cst_13 = arith.constant dense<0.000000e+00> : vector<16x32xf32>
    %46 = tpu.matmul %45, %35, %cst_13 {dimension_numbers = #tpu.dot_dimension_numbers<[1], [0], [0], [1], [0, 0, 1, 1], [], []>} : vector<16x64xbf16>, vector<64x32xbf16>, vector<16x32xf32> -> vector<16x32xf32>
    %47 = arith.truncf %29 : vector<64x32xf32> to vector<64x32xbf16>
    %cst_14 = arith.constant dense<0.000000e+00> : vector<16x32xf32>
    %48 = tpu.matmul %45, %47, %cst_14 {dimension_numbers = #tpu.dot_dimension_numbers<[1], [0], [0], [1], [0, 0, 1, 1], [], []>} : vector<16x64xbf16>, vector<64x32xbf16>, vector<16x32xf32> -> vector<16x32xf32>
    %cst_15 = arith.constant 1.000000e-30 : f32
    %49 = vector.broadcast %cst_15 : f32 to vector<16x32xf32>
    %50 = arith.maximumf %48, %49 : vector<16x32xf32>
    %51 = tpu.reciprocal %50 {approx = true} : vector<16x32xf32> -> vector<16x32xf32>
    %52 = arith.mulf %46, %51 : vector<16x32xf32>
    %c192 = arith.constant 192 : index
    %c0_16 = arith.constant 0 : index
    %53 = vector.load %arg1[%c192, %c0_16] : memref<312x128xf32, #tpu.memory_space<vmem>>, vector<32x32xf32>
    %c226 = arith.constant 226 : index
    %c0_17 = arith.constant 0 : index
    %54 = vector.load %arg1[%c226, %c0_17] : memref<312x128xf32, #tpu.memory_space<vmem>>, vector<1x32xf32>
    %55 = arith.truncf %52 : vector<16x32xf32> to vector<16x32xbf16>
    %56 = arith.truncf %53 : vector<32x32xf32> to vector<32x32xbf16>
    %cst_18 = arith.constant dense<0.000000e+00> : vector<16x32xf32>
    %57 = tpu.matmul %55, %56, %cst_18 {dimension_numbers = #tpu.dot_dimension_numbers<[1], [0], [0], [1], [0, 0, 1, 1], [], []>} : vector<16x32xbf16>, vector<32x32xbf16>, vector<16x32xf32> -> vector<16x32xf32>
    %58 = vector.broadcast %54 : vector<1x32xf32> to vector<16x32xf32>
    %59 = arith.addf %57, %58 : vector<16x32xf32>
    %60 = arith.addf %0, %59 : vector<16x32xf32>
    %cst_19 = arith.constant dense<0.000000e+00> : vector<16xf32>
    %61 = vector.multi_reduction <add>, %60, %cst_19 [1] : vector<16x32xf32> to vector<16xf32>
    %62 = vector.shape_cast %61 : vector<16xf32> to vector<16x1xf32>
    %cst_20 = arith.constant 3.200000e+01 : f32
    %63 = vector.broadcast %cst_20 : f32 to vector<16x1xf32>
    %64 = arith.divf %62, %63 : vector<16x1xf32>
    %65 = vector.broadcast %64 : vector<16x1xf32> to vector<16x32xf32>
    %66 = arith.subf %60, %65 : vector<16x32xf32>
    %67 = arith.mulf %66, %66 : vector<16x32xf32>
    %cst_21 = arith.constant dense<0.000000e+00> : vector<16xf32>
    %68 = vector.multi_reduction <add>, %67, %cst_21 [1] : vector<16x32xf32> to vector<16xf32>
    %69 = vector.shape_cast %68 : vector<16xf32> to vector<16x1xf32>
    %cst_22 = arith.constant 3.200000e+01 : f32
    %70 = vector.broadcast %cst_22 : f32 to vector<16x1xf32>
    %71 = arith.divf %69, %70 : vector<16x1xf32>
    %72 = vector.broadcast %64 : vector<16x1xf32> to vector<16x32xf32>
    %73 = arith.subf %60, %72 : vector<16x32xf32>
    %cst_23 = arith.constant 9.99999974E-6 : f32
    %74 = vector.broadcast %cst_23 : f32 to vector<16x1xf32>
    %75 = arith.addf %71, %74 : vector<16x1xf32>
    %76 = math.rsqrt %75 : vector<16x1xf32>
    %77 = vector.broadcast %76 : vector<16x1xf32> to vector<16x32xf32>
    %78 = arith.mulf %73, %77 : vector<16x32xf32>
    %c32 = arith.constant 32 : index
    %c0_24 = arith.constant 0 : index
    %79 = vector.load %arg1[%c32, %c0_24] : memref<312x128xf32, #tpu.memory_space<vmem>>, vector<32x128xf32>
    %c225 = arith.constant 225 : index
    %c0_25 = arith.constant 0 : index
    %80 = vector.load %arg1[%c225, %c0_25] : memref<312x128xf32, #tpu.memory_space<vmem>>, vector<1x128xf32>
    %81 = arith.truncf %78 : vector<16x32xf32> to vector<16x32xbf16>
    %82 = arith.truncf %79 : vector<32x128xf32> to vector<32x128xbf16>
    %cst_26 = arith.constant dense<0.000000e+00> : vector<16x128xf32>
    %83 = tpu.matmul %81, %82, %cst_26 {dimension_numbers = #tpu.dot_dimension_numbers<[1], [0], [0], [1], [0, 0, 1, 1], [], []>} : vector<16x32xbf16>, vector<32x128xbf16>, vector<16x128xf32> -> vector<16x128xf32>
    %84 = vector.broadcast %80 : vector<1x128xf32> to vector<16x128xf32>
    %85 = arith.addf %83, %84 : vector<16x128xf32>
    %cst_27 = arith.constant 1.702000e+00 : f32
    %86 = vector.broadcast %cst_27 : f32 to vector<16x128xf32>
    %87 = arith.mulf %86, %85 : vector<16x128xf32>
    %88 = arith.negf %87 : vector<16x128xf32>
    %89 = math.exp %88 : vector<16x128xf32>
    %cst_28 = arith.constant 1.000000e+00 : f32
    %90 = vector.broadcast %cst_28 : f32 to vector<16x128xf32>
    %91 = arith.addf %90, %89 : vector<16x128xf32>
    %92 = arith.divf %90, %91 : vector<16x128xf32>
    %93 = arith.mulf %85, %92 : vector<16x128xf32>
    %c64 = arith.constant 64 : index
    %c0_29 = arith.constant 0 : index
    %94 = vector.load %arg1[%c64, %c0_29] : memref<312x128xf32, #tpu.memory_space<vmem>>, vector<128x32xf32>
    %c227 = arith.constant 227 : index
    %c0_30 = arith.constant 0 : index
    %95 = vector.load %arg1[%c227, %c0_30] : memref<312x128xf32, #tpu.memory_space<vmem>>, vector<1x32xf32>
    %96 = arith.truncf %93 : vector<16x128xf32> to vector<16x128xbf16>
    %97 = arith.truncf %94 : vector<128x32xf32> to vector<128x32xbf16>
    %cst_31 = arith.constant dense<0.000000e+00> : vector<16x32xf32>
    %98 = tpu.matmul %96, %97, %cst_31 {dimension_numbers = #tpu.dot_dimension_numbers<[1], [0], [0], [1], [0, 0, 1, 1], [], []>} : vector<16x128xbf16>, vector<128x32xbf16>, vector<16x32xf32> -> vector<16x32xf32>
    %99 = vector.broadcast %95 : vector<1x32xf32> to vector<16x32xf32>
    %100 = arith.addf %98, %99 : vector<16x32xf32>
    %101 = arith.addf %60, %100 : vector<16x32xf32>
    %c0_32 = arith.constant 0 : index
    %c0_33 = arith.constant 0 : index
    %102 = vector.load %arg2[%c0_32, %c0_33] : memref<16x32xf32, #tpu.memory_space<vmem>>, vector<16x32xf32>
    tpu.vector_store %arg2[%c0_32, %c0_33], %101 {strides = array<i32>} : memref<16x32xf32, #tpu.memory_space<vmem>>, vector<16x32xf32>,
    return
  }
}

</mosaic_0001>

<bundles_post_ra>
// kernel: residual_attention_block.1
= control target key start
LH: loop header
LB: loop body
LE: loop exit
PB: predicated region body
PF: predicated region fallthrough
CT: control target
= control target key end

     0   :  { %vm15_vm0 = vcmask 261120   ;;  %s1134_s0 = inlined_call_operand.vmem [shape: f32[16,32], index: 0, kind: input, shape index: {}]   ;;  %s1135_s1 = inlined_call_operand.vmem [shape: f32[312,128], index: 1, kind: input, shape index: {}]   ;;  %s1136_s2 = inlined_call_operand.hbm [shape: f32[16,32], index: 2, kind: output, shape index: {}]  }
   0x1   :  { %v837_v0 = vld [vmem:[%s1134_s0] sm:$0xff]  ;;  %v842_v1 = vld [vmem:[%s1134_s0 + $0x8] sm:$0xff] }
   0x2   :  { %7 = vsyncpa [#allocation3], 0  ;;  %v16_v2 = vsel %vm15_vm0, %v837_v0, 0.0  ;;  %v19_v3 = vsel %vm15_vm0, %v842_v1, 0.0  ;;  %v43_v14 = vld [vmem:[%s1135_s1] sm:$0xff]  ;;  %v44_v15 = vld [vmem:[%s1135_s1 + $0x8] sm:$0xff] }
   0x3   :  { %17 = vadd.xlane.f32.xlu0 %v16_v2  ;;  %v45_v16 = vld [vmem:[%s1135_s1 + $0x10] sm:$0xff]  ;;  %v811_v17 = vmov 0.0   ;;  %v49_v18 = vpack.c.bf16 %v44_v15, %v43_v14  ;;  %v46_v19 = vld [vmem:[%s1135_s1 + $0x18] sm:$0xff]  ;;  %vm812_vm1 = vmmov 0   ;;  %v880_v22 = vld [vmem:[%s1135_s1 + $0xe8] sm:$0xff]  ;;  %s813_s24 = smov 32  }
   0x4   :  { %675 = vmatprep.subr.bf16.mxu0 %v811_v17  ;;  %679 = vmatprep.mubr.msk.bf16.mxu0 %vm812_vm1, %v811_v17  ;;  %v50_v20 = vpack.c.bf16 %v46_v19, %v45_v16  ;;  %v875_v21 = vld [vmem:[%s1135_s1 + $0xf0] sm:$0xff]  ;;  %v887_v23 = vld [vmem:[%s1135_s1 + $0xf8] sm:$0xff]  ;;  %v892_v24 = vld [vmem:[%s1135_s1 + $0x108] sm:$0xff]  ;;  %s814_s11 = smov 96   ;;  %s815_s12 = smov 64   ;;  %vm258_vm2 = vcmask 523264  }
   0x5   :  { %683 = vmatprep.subr.bf16.mxu1 %v811_v17  ;;  %691 = vmatprep.mubr.msk.bf16.mxu1 %vm812_vm1, %v811_v17  ;;  %v899_v25 = vld [vmem:[%s1135_s1 + $0x100] sm:$0xff]  ;;  %v904_v26 = vld [vmem:[%s1135_s1 + $0x118] sm:$0xff]  ;;  %v911_v27 = vld [vmem:[%s1135_s1 + $0x110] sm:$0xff]  ;;  %s816_s0 = smov [#allocation2]  }
   0x6   :  { %676 = vmatpush3.bf16.msra.mxu0 %v49_v18  ;;  %v917_v28 = vld [vmem:[%s1135_s1 + $0x120] sm:$0xff]  ;;  %s619_s13 = sshll.u32 %s816_s0, 4  ;;  %s620_s13 = int_to_ptr.vmem [resolvable:$true] %s619_s13 }
   0x7   :  { %20 = vadd.xlane.f32.xlu0 %v19_v3  ;;  %677 = vmatprep.subr.bf16.mxu0 %v811_v17  ;;  %v630_v44 = vld [vmem:[%s1135_s1 + $0xe0] ss:$0 sm:$0xff]  ;;  %s787_s14 = scalar_lea.vmem %s620_s13, 256  ;;  %p792_p1 = scmp.lt.s32.totalorder %s620_s13, %s620_s13 }
   0x8   :  { %p788_p0 = scmp.ne.s32.totalorder %s620_s13, %s787_s14  ;;  %p793_p2 = scmp.lt.s32.totalorder %s787_s14, %s787_s14 }
   0xa   :  { %678 = vmatpush3.bf16.msra.mxu0 %v50_v20  ;;  %p794_p3 = por %p793_p2, %p792_p1 }
   0xb   :  { %695 = vmatprep.subr.bf16.mxu0 %v811_v17 }
   0xc   :  { %p795_p4 = pnand %p794_p3, %p788_p0 }
  0x1d   :  { %115 = vrot.lane.b32.xlu0 %v880_v22, %s813_s24 }
  0x21   :  { %123 = vrot.lane.b32.xlu0 %v892_v24, %s813_s24 }
  0x25   :  { %127 = vrot.lane.b32.xlu0 %v904_v26, %s813_s24 }
  0x90   :  { %v18_v4 = vpop.xlane.xlu0 %17 }
  0x91   :  { %v23_v5 = vmul.f32 0.03125, %v18_v4 }
  0x93   :  { %v25_v6 = vsub.f32 %v837_v0, %v23_v5 }
  0x94   :  { %v21_v7 = vpop.xlane.xlu0 %20 }
  0x95   :  { %v24_v8 = vmul.f32 0.03125, %v21_v7  ;;  %v27_v9 = vmul.f32 %v25_v6, %v25_v6 }
  0x97   :  { %v26_v10 = vsub.f32 %v842_v1, %v24_v8  ;;  %v29_v11 = vsel %vm15_vm0, %v27_v9, 0.0 }
  0x98   :  { %30 = vadd.xlane.f32.xlu1 %v29_v11  ;;  %v116_v43 = vpop.permute.xlu0 %115 }
  0x99   :  { %v28_v12 = vmul.f32 %v26_v10, %v26_v10 }
  0x9b   :  { %v32_v13 = vsel %vm15_vm0, %v28_v12, 0.0 }
  0x9c   :  { %33 = vadd.xlane.f32.xlu1 %v32_v13  ;;  %v124_v46 = vpop.permute.xlu0 %123 }
  0xa0   :  { %v128_v58 = vpop.permute.xlu0 %127 }
  0xad   :  { %117 = vrot.lane.b32.xlu1 %v875_v21, %s813_s24 }
  0xb1   :  { %119 = vrot.lane.b32.xlu1 %v887_v23, %s813_s24 }
  0xb5   :  { %121 = vrot.lane.b32.xlu1 %v899_v25, %s813_s24 }
  0xb9   :  { %125 = vrot.lane.b32.xlu1 %v911_v27, %s813_s24 }
  0xbd   :  { %129 = vrot.lane.b32.xlu1 %v917_v28, %s813_s24 }
 0x125   :  { %v31_v29 = vpop.xlane.xlu1 %30 }
 0x126   :  { %v35_v30 = vmul.f32 0.03125, %v31_v29 }
 0x128   :  { %v37_v31 = vadd.f32 1e-05, %v35_v30 }
 0x129   :  { %v34_v32 = vpop.xlane.xlu1 %33 }
 0x12a   :  { %v36_v33 = vmul.f32 0.03125, %v34_v32  ;;  %763 = vrsqrt.f32 %v37_v31 }
 0x12c   :  { %v38_v34 = vadd.f32 1e-05, %v36_v33 }
 0x12d   :  { %v118_v40 = vpop.permute.xlu1 %117 }
 0x12e   :  { %765 = vrsqrt.f32 %v38_v34 }
 0x131   :  { %v120_v41 = vpop.permute.xlu1 %119 }
 0x134   :  { %v764_v35 = vpop.eup %763 }
 0x135   :  { %v41_v37 = vmul.f32 %v764_v35, %v25_v6  ;;  %v122_v42 = vpop.permute.xlu1 %121 }
 0x138   :  { %v766_v36 = vpop.eup %765 }
 0x139   :  { %v42_v38 = vmul.f32 %v766_v36, %v26_v10  ;;  %v126_v45 = vpop.permute.xlu1 %125 }
 0x13b   :  { %v48_v39 = vpack.c.bf16 %v42_v38, %v41_v37 }
 0x13d   :  { %680 = vmatmul.mubr.msk.bf16.vlgmr.msra.gmra.mrb[0].mxu0 %vm15_vm0, %v48_v39  ;;  %v130_v53 = vpop.permute.xlu1 %129 }
 0x13e   :  { %703 = vmatprep.mubr.msk.bf16.mxu0 %vm812_vm1, %v811_v17 }
 0x210   :  { %v92_v47 = vpop.f32.mrb[0].mxu0 }
 0x211   :  { %v926_v48 = vadd.f32 %v630_v44, %v92_v47  ;;  %v681_v49 = vpop.f32.mrb[1].mxu0 }
 0x212   :  { %v95_v50 = vpop.f32.mrb[2].mxu0 }
 0x213   :  { %v928_v51 = vadd.f32 %v630_v44, %v95_v50  ;;  %v682_v52 = vpop.f32.mrb[3].mxu0  ;;  %v141_v54 = vmul.f32 %v120_v41, %v926_v48  ;;  %v139_v56 = vmul.f32 %v116_v43, %v926_v48  ;;  %v145_v63 = vmul.f32 %v128_v58, %v926_v48  ;;  %v189_v44 = vld [vmem:[%s1135_s1 + $0x130] sm:$0xff] }
 0x214   :  { %v143_v2 = vmul.f32 %v124_v46, %v926_v48 }
 0x215   :  { %v142_v55 = vmul.f32 %v122_v42, %v928_v51  ;;  %v140_v57 = vmul.f32 %v118_v40, %v928_v51  ;;  %v146_v59 = vmul.f32 %v130_v53, %v928_v51  ;;  %v144_v62 = vmul.f32 %v126_v45, %v928_v51  ;;  %v188_v42 = vld [vmem:[%s1135_s1 + $0x128] sm:$0xff] }
 0x216   :  { %v187_v37 = vpack.c.bf16 %v928_v51, %v926_v48 }
 0x217   :  { %v148_v60 = vpack.c.bf16 %v142_v55, %v141_v54  ;;  %v147_v61 = vpack.c.bf16 %v140_v57, %v139_v56  ;;  %v150_v3 = vpack.c.bf16 %v146_v59, %v145_v63  ;;  %v149_v4 = vpack.c.bf16 %v144_v62, %v143_v2 }
 0x219   :  { %196 = vrot.lane.b32.xlu1 %v148_v60, %s814_s11  ;;  %194 = vrot.lane.b32.xlu0 %v147_v61, %s814_s11 }
 0x21d   :  { %198 = vrot.lane.b32.xlu0 %v149_v4, %s814_s11  ;;  %200 = vrot.lane.b32.xlu1 %v150_v3, %s814_s11  ;;  %v332_v3 = vpack.c.bf16 %v875_v21, %v880_v22 }
 0x221   :  { %151 = vrot.lane.b32.xlu0 %v880_v22, %s815_s12  ;;  %153 = vrot.lane.b32.xlu1 %v875_v21, %s815_s12  ;;  %v335_v21 = vpack.c.bf16 %v917_v28, %v904_v26  ;;  %v383_v22 = vld [vmem:[%s1135_s1 + $0xc0] sm:$0xff] }
 0x225   :  { %155 = vrot.lane.b32.xlu0 %v887_v23, %s815_s12  ;;  %157 = vrot.lane.b32.xlu1 %v899_v25, %s815_s12 }
 0x229   :  { %159 = vrot.lane.b32.xlu0 %v892_v24, %s815_s12  ;;  %161 = vrot.lane.b32.xlu1 %v911_v27, %s815_s12 }
 0x22d   :  { %163 = vrot.lane.b32.xlu0 %v904_v26, %s815_s12  ;;  %165 = vrot.lane.b32.xlu1 %v917_v28, %s815_s12  ;;  %v386_v26 = vld [vmem:[%s1135_s1 + $0xd8] sm:$0xff] }
 0x28b   :  { %v197_v5 = vpop.permute.xlu1 %196  ;;  %v195_v6 = vpop.permute.xlu0 %194 }
 0x28c   :  { %v206_v7 = vsel %vm15_vm0, %v195_v6, 0  ;;  %v209_v12 = vsel %vm15_vm0, %v197_v5, 0  ;;  %v333_v5 = vpack.c.bf16 %v899_v25, %v887_v23  ;;  %v334_v6 = vpack.c.bf16 %v911_v27, %v892_v24  ;;  %v384_v23 = vld [vmem:[%s1135_s1 + $0xc8] sm:$0xff]  ;;  %v385_v25 = vld [vmem:[%s1135_s1 + $0xd0] sm:$0xff] }
 0x28d   :  { %684 = vmatpush3.bf16.xpose.msra.mxu1 %v206_v7  ;;  %v389_v24 = vpack.c.bf16 %v384_v23, %v383_v22  ;;  %v390_v27 = vpack.c.bf16 %v386_v26, %v385_v25  ;;  %v542_v22 = vld [vmem:[%s1135_s1 + $0x58] sm:$0xff]  ;;  %v544_v25 = vld [vmem:[%s1135_s1 + $0x68] sm:$0xff] }
 0x28e   :  { %685 = vmatprep.subr.bf16.mxu1 %v811_v17 }
 0x28f   :  { %v201_v8 = vpop.permute.xlu1 %200  ;;  %v199_v9 = vpop.permute.xlu0 %198 }
 0x290   :  { %v212_v32 = vsel %vm15_vm0, %v199_v9, 0  ;;  %v215_v36 = vsel %vm15_vm0, %v201_v8, 0 }
 0x293   :  { %v154_v10 = vpop.permute.xlu1 %153  ;;  %v152_v11 = vpop.permute.xlu0 %151 }
 0x294   :  { %v176_v13 = vmul.f32 %v154_v10, %v928_v51  ;;  %v175_v14 = vmul.f32 %v152_v11, %v926_v48 }
 0x295   :  { %686 = vmatpush3.bf16.xpose.msra.mxu1 %v209_v12 }
 0x296   :  { %v183_v15 = vpack.c.bf16 %v176_v13, %v175_v14  ;;  %687 = vmatprep.subr.bf16.mxu1 %v811_v17 }
 0x297   :  { %v158_v16 = vpop.permute.xlu1 %157  ;;  %v156_v18 = vpop.permute.xlu0 %155 }
 0x298   :  { %v178_v19 = vmul.f32 %v158_v16, %v928_v51  ;;  %v177_v20 = vmul.f32 %v156_v18, %v926_v48  ;;  %276 = vrot.lane.b32.xlu0 %v183_v15, %s815_s12 }
 0x29a   :  { %v184_v29 = vpack.c.bf16 %v178_v19, %v177_v20 }
 0x29b   :  { %v162_v30 = vpop.permute.xlu1 %161  ;;  %v160_v31 = vpop.permute.xlu0 %159 }
 0x29c   :  { %v180_v33 = vmul.f32 %v162_v30, %v928_v51  ;;  %v179_v34 = vmul.f32 %v160_v31, %v926_v48  ;;  %278 = vrot.lane.b32.xlu1 %v184_v29, %s815_s12  ;;  %v635_v30 = vld [vmem:[%s1135_s1 + $0xe2] ss:$0 sm:$0xff] }
 0x29d   :  { %688 = vmatpush3.bf16.xpose.msra.mxu1 %v212_v32 }
 0x29e   :  { %v185_v35 = vpack.c.bf16 %v180_v33, %v179_v34  ;;  %689 = vmatprep.subr.bf16.mxu1 %v811_v17 }
 0x29f   :  { %v164_v38 = vpop.permute.xlu0 %163  ;;  %v166_v39 = vpop.permute.xlu1 %165 }
 0x2a0   :  { %v182_v54 = vmul.f32 %v166_v39, %v928_v51  ;;  %v181_v55 = vmul.f32 %v164_v38, %v926_v48 }
 0x2a2   :  { %v186_v56 = vpack.c.bf16 %v182_v54, %v181_v55  ;;  %v469_v54 = vld [vmem:[%s1135_s1 + $0x30] sm:$0xff]  ;;  %v470_v55 = vld [vmem:[%s1135_s1 + $0x38] sm:$0xff] }
 0x2a5   :  { %690 = vmatpush3.bf16.xpose.msra.mxu1 %v215_v36 }
 0x2a6   :  { %735 = vmatprep.subr.bf16.mxu1 %v811_v17 }
 0x2ac   :  { %692 = vmatmul.mubr.msk.bf16.vlgmr.msra.gmra.mrb[0].mxu1 %vm15_vm0, %v187_v37 }
 0x2ad   :  { %751 = vmatprep.mubr.msk.bf16.mxu1 %vm812_vm1, %v811_v17 }
 0x30a   :  { %v277_v40 = vpop.permute.xlu0 %276 }
 0x30b   :  { %696 = vmatpush3.bf16.msra.mxu0 %v277_v40 }
 0x30c   :  { %697 = vmatprep.subr.bf16.mxu0 %v811_v17 }
 0x30e   :  { %v279_v41 = vpop.permute.xlu1 %278 }
 0x30f   :  { %698 = vmatpush3.bf16.msra.mxu0 %v279_v41 }
 0x310   :  { %699 = vmatprep.subr.bf16.mxu0 %v811_v17 }
 0x37f   :  { %v251_v43 = vpop.f32.mrb[0].mxu1 }
 0x380   :  { %v252_v45 = vadd.f32 %v251_v43, %v188_v42  ;;  %v693_v46 = vpop.f32.mrb[1].mxu1 }
 0x381   :  { %v254_v47 = vpop.f32.mrb[2].mxu1 }
 0x382   :  { %v255_v49 = vadd.f32 %v254_v47, %v189_v44  ;;  %v694_v50 = vpop.f32.mrb[3].mxu1  ;;  %v259_v52 = vsel %vm258_vm2, %v252_v45, -inf }
 0x383   :  { %260 = vmax.xlane.f32.xlu0 %v259_v52  ;;  %v467_v50 = vld [vmem:[%s1135_s1 + $0x20] sm:$0xff]  ;;  %v468_v52 = vld [vmem:[%s1135_s1 + $0x28] sm:$0xff] }
 0x384   :  { %v262_v53 = vsel %vm258_vm2, %v255_v49, -inf }
 0x385   :  { %263 = vmax.xlane.f32.xlu1 %v262_v53  ;;  %v473_v53 = vpack.c.bf16 %v468_v52, %v467_v50 }
 0x396   :  { %282 = vrot.lane.b32.xlu1 %v186_v56, %s815_s12  ;;  %v474_v56 = vpack.c.bf16 %v470_v55, %v469_v54 }
 0x399   :  { %280 = vrot.lane.b32.xlu0 %v185_v35, %s815_s12 }
 0x410   :  { %v261_v57 = vpop.xlane.xlu0 %260 }
 0x411   :  { %v265_v58 = vsub.f32 %v252_v45, %v261_v57 }
 0x412   :  { %v264_v59 = vpop.xlane.xlu1 %263 }
 0x413   :  { %v267_v60 = vmul.f32 1.442695, %v265_v58  ;;  %v266_v61 = vsub.f32 %v255_v49, %v264_v59 }
 0x414   :  { %v281_v62 = vpop.permute.xlu0 %280 }
 0x415   :  { %v269_v63 = vmul.f32 1.442695, %v266_v61  ;;  %700 = vmatpush3.bf16.msra.mxu0 %v281_v62  ;;  %767 = vpow2.f32 %v267_v60 }
 0x416   :  { %701 = vmatprep.subr.bf16.mxu0 %v811_v17  ;;  %v283_v51 = vpop.permute.xlu1 %282 }
 0x417   :  { %769 = vpow2.f32 %v269_v63 }
 0x419   :  { %702 = vmatpush3.bf16.msra.mxu0 %v283_v51 }
 0x41a   :  { %707 = vmatprep.subr.bf16.mxu0 %v811_v17 }
 0x41f   :  { %v768_v48 = vpop.eup %767 }
 0x421   :  { %v770_v2 = vpop.eup %769 }
 0x422   :  { %v271_v4 = vpack.c.bf16 %v770_v2, %v768_v48 }
 0x424   :  { %704 = vmatmul.mubr.msk.bf16.vlgmr.msra.gmra.mrb[4].mxu0 %vm258_vm2, %v271_v4 }
 0x425   :  { %708 = vmatpush3.bf16.msra.mxu0 %v332_v3  ;;  %715 = vmatprep.mubr.msk.bf16.mxu0 %vm812_vm1, %v811_v17 }
 0x426   :  { %709 = vmatprep.subr.bf16.mxu0 %v811_v17 }
 0x429   :  { %710 = vmatpush3.bf16.msra.mxu0 %v333_v5  ;;  %v540_v5 = vld [vmem:[%s1135_s1 + $0x48] sm:$0xff] }
 0x42a   :  { %711 = vmatprep.subr.bf16.mxu0 %v811_v17 }
 0x42d   :  { %712 = vmatpush3.bf16.msra.mxu0 %v334_v6 }
 0x42e   :  { %713 = vmatprep.subr.bf16.mxu0 %v811_v17 }
 0x431   :  { %714 = vmatpush3.bf16.msra.mxu0 %v335_v21  ;;  %v541_v21 = vld [vmem:[%s1135_s1 + $0x50] sm:$0xff] }
 0x432   :  { %719 = vmatprep.subr.bf16.mxu0 %v811_v17  ;;  %v558_v23 = vpack.c.bf16 %v542_v22, %v541_v21 }
 0x434   :  { %716 = vmatmul.mubr.msk.bf16.vlgmr.msra.gmra.mrb[8].mxu0 %vm258_vm2, %v271_v4  ;;  %v539_v4 = vld [vmem:[%s1135_s1 + $0x40] sm:$0xff] }
 0x435   :  { %723 = vmatprep.mubr.msk.bf16.mxu0 %vm812_vm1, %v811_v17  ;;  %720 = vmatpush3.bf16.msra.mxu0 %v389_v24  ;;  %v557_v6 = vpack.c.bf16 %v540_v5, %v539_v4  ;;  %v543_v24 = vld [vmem:[%s1135_s1 + $0x60] sm:$0xff] }
 0x436   :  { %721 = vmatprep.subr.bf16.mxu0 %v811_v17  ;;  %v559_v26 = vpack.c.bf16 %v544_v25, %v543_v24 }
 0x437   :  { %736 = vmatpush3.bf16.msra.mxu1 %v557_v6 }
 0x438   :  { %737 = vmatprep.subr.bf16.mxu1 %v811_v17 }
 0x439   :  { %722 = vmatpush3.bf16.msra.mxu0 %v390_v27  ;;  %v545_v27 = vld [vmem:[%s1135_s1 + $0x70] sm:$0xff] }
 0x43a   :  { %727 = vmatprep.subr.bf16.mxu0 %v811_v17 }
 0x43b   :  { %738 = vmatpush3.bf16.msra.mxu1 %v558_v23 }
 0x43c   :  { %739 = vmatprep.subr.bf16.mxu1 %v811_v17 }
 0x43f   :  { %740 = vmatpush3.bf16.msra.mxu1 %v559_v26 }
 0x440   :  { %741 = vmatprep.subr.bf16.mxu1 %v811_v17 }
 0x4f7   :  { %v325_v28 = vpop.f32.mrb[4].mxu0 }
 0x4f8   :  { %v705_v7 = vpop.f32.mrb[5].mxu0 }
 0x4f9   :  { %v328_v8 = vpop.f32.mrb[6].mxu0 }
 0x4fa   :  { %v706_v9 = vpop.f32.mrb[7].mxu0 }
 0x4fb   :  { %v548_v9 = vld [vmem:[%s1135_s1 + $0x88] sm:$0xff] }
 0x507   :  { %v370_v10 = vpop.f32.mrb[8].mxu0 }
 0x508   :  { %v377_v11 = vmax.f32 %v370_v10, 1e-30  ;;  %v717_v12 = vpop.f32.mrb[9].mxu0 }
 0x509   :  { %v373_v13 = vpop.f32.mrb[10].mxu0  ;;  %v550_v12 = vld [vmem:[%s1135_s1 + $0x98] sm:$0xff] }
 0x50a   :  { %771 = vrcp.f32 %v377_v11  ;;  %v378_v14 = vmax.f32 %v373_v13, 1e-30  ;;  %v718_v15 = vpop.f32.mrb[11].mxu0  ;;  %v549_v11 = vld [vmem:[%s1135_s1 + $0x90] sm:$0xff] }
 0x50b   :  { %v562_v13 = vpack.c.bf16 %v550_v12, %v549_v11  ;;  %v552_v15 = vld [vmem:[%s1135_s1 + $0xa8] sm:$0xff] }
 0x50c   :  { %773 = vrcp.f32 %v378_v14  ;;  %v551_v14 = vld [vmem:[%s1135_s1 + $0xa0] sm:$0xff] }
 0x514   :  { %v772_v16 = vpop.eup %771 }
 0x515   :  { %v381_v18 = vmul.f32 %v772_v16, %v325_v28  ;;  %v546_v28 = vld [vmem:[%s1135_s1 + $0x78] sm:$0xff]  ;;  %v563_v16 = vpack.c.bf16 %v552_v15, %v551_v14 }
 0x516   :  { %v774_v19 = vpop.eup %773  ;;  %v560_v7 = vpack.c.bf16 %v546_v28, %v545_v27 }
 0x517   :  { %v382_v20 = vmul.f32 %v774_v19, %v328_v8  ;;  %v547_v8 = vld [vmem:[%s1135_s1 + $0x80] sm:$0xff]  ;;  %v554_v19 = vld [vmem:[%s1135_s1 + $0xb8] sm:$0xff] }
 0x518   :  { %742 = vmatpush3.bf16.msra.mxu1 %v560_v7  ;;  %v561_v10 = vpack.c.bf16 %v548_v9, %v547_v8 }
 0x519   :  { %v388_v29 = vpack.c.bf16 %v382_v20, %v381_v18  ;;  %743 = vmatprep.subr.bf16.mxu1 %v811_v17  ;;  %v553_v18 = vld [vmem:[%s1135_s1 + $0xb0] sm:$0xff] }
 0x51a   :  { %v564_v20 = vpack.c.bf16 %v554_v19, %v553_v18 }
 0x51b   :  { %724 = vmatmul.mubr.msk.bf16.vlgmr.msra.gmra.mrb[12].mxu0 %vm15_vm0, %v388_v29  ;;  %v637_v29 = vld [vmem:[%s1135_s1 + $0xe1] ss:$0 sm:$0xff] }
 0x51c   :  { %731 = vmatprep.mubr.msk.bf16.mxu0 %vm812_vm1, %v811_v17  ;;  %728 = vmatpush3.bf16.msra.mxu0 %v473_v53 }
 0x51d   :  { %729 = vmatprep.subr.bf16.mxu0 %v811_v17  ;;  %744 = vmatpush3.bf16.msra.mxu1 %v561_v10 }
 0x51e   :  { %745 = vmatprep.subr.bf16.mxu1 %v811_v17 }
 0x520   :  { %730 = vmatpush3.bf16.msra.mxu0 %v474_v56 }
 0x521   :  { %746 = vmatpush3.bf16.msra.mxu1 %v562_v13 }
 0x522   :  { %747 = vmatprep.subr.bf16.mxu1 %v811_v17 }
 0x525   :  { %748 = vmatpush3.bf16.msra.mxu1 %v563_v16 }
 0x526   :  { %749 = vmatprep.subr.bf16.mxu1 %v811_v17 }
 0x529   :  { %750 = vmatpush3.bf16.msra.mxu1 %v564_v20 }
 0x5ee   :  { %v432_v31 = vpop.f32.mrb[12].mxu0 }
 0x5ef   :  { %v433_v32 = vadd.f32 %v635_v30, %v432_v31  ;;  %v725_v33 = vpop.f32.mrb[13].mxu0 }
 0x5f0   :  { %v435_v34 = vpop.f32.mrb[14].mxu0 }
 0x5f1   :  { %v1030_v35 = vadd.f32 %v433_v32, %v837_v0  ;;  %v436_v36 = vadd.f32 %v635_v30, %v435_v34  ;;  %v726_v37 = vpop.f32.mrb[15].mxu0 }
 0x5f3   :  { %v1033_v38 = vadd.f32 %v436_v36, %v842_v1  ;;  %v441_v39 = vsel %vm15_vm0, %v1030_v35, 0.0 }
 0x5f4   :  { %442 = vadd.xlane.f32.xlu0 %v441_v39 }
 0x5f5   :  { %v444_v40 = vsel %vm15_vm0, %v1033_v38, 0.0 }
 0x5f6   :  { %445 = vadd.xlane.f32.xlu1 %v444_v40 }
 0x681   :  { %v443_v41 = vpop.xlane.xlu0 %442 }
 0x682   :  { %v447_v42 = vmul.f32 0.03125, %v443_v41 }
 0x683   :  { %v446_v43 = vpop.xlane.xlu1 %445 }
 0x684   :  { %v449_v44 = vsub.f32 %v1030_v35, %v447_v42  ;;  %v448_v0 = vmul.f32 0.03125, %v446_v43 }
 0x686   :  { %v450_v45 = vsub.f32 %v1033_v38, %v448_v0  ;;  %v451_v46 = vmul.f32 %v449_v44, %v449_v44 }
 0x688   :  { %v453_v1 = vsel %vm15_vm0, %v451_v46, 0.0  ;;  %v452_v47 = vmul.f32 %v450_v45, %v450_v45 }
 0x689   :  { %454 = vadd.xlane.f32.xlu0 %v453_v1 }
 0x68a   :  { %v456_v49 = vsel %vm15_vm0, %v452_v47, 0.0 }
 0x68d   :  { %457 = vadd.xlane.f32.xlu0 %v456_v49  ;;  %v641_v49 = vld [vmem:[%s1135_s1 + $0xe3] ss:$0 sm:$0xff] }
 0x716   :  { %v455_v57 = vpop.xlane.xlu0 %454 }
 0x717   :  { %v459_v58 = vmul.f32 0.03125, %v455_v57 }
 0x719   :  { %v461_v59 = vadd.f32 1e-05, %v459_v58 }
 0x71a   :  { %v458_v60 = vpop.xlane.xlu0 %457 }
 0x71b   :  { %v460_v61 = vmul.f32 0.03125, %v458_v60  ;;  %775 = vrsqrt.f32 %v461_v59 }
 0x71d   :  { %v462_v62 = vadd.f32 1e-05, %v460_v61 }
 0x71f   :  { %777 = vrsqrt.f32 %v462_v62 }
 0x725   :  { %v776_v63 = vpop.eup %775 }
 0x726   :  { %v465_v48 = vmul.f32 %v776_v63, %v449_v44 }
 0x729   :  { %v778_v51 = vpop.eup %777 }
 0x72a   :  { %v466_v2 = vmul.f32 %v778_v51, %v450_v45 }
 0x72c   :  { %v472_v3 = vpack.c.bf16 %v466_v2, %v465_v48 }
 0x72e   :  { %732 = vmatmul.mubr.msk.bf16.vlgmr.msra.gmra.mrb[16].mxu0 %vm15_vm0, %v472_v3 }
 0x801   :  { %v516_v30 = vpop.f32.mrb[16].mxu0 }
 0x802   :  { %v517_v31 = vadd.f32 %v637_v29, %v516_v30  ;;  %v733_v32 = vpop.f32.mrb[17].mxu0 }
 0x803   :  { %v519_v33 = vpop.f32.mrb[18].mxu0 }
 0x804   :  { %v639_v34 = vmul.f32 -1.702, %v517_v31  ;;  %v520_v17 = vadd.f32 %v637_v29, %v519_v33  ;;  %v734_v36 = vpop.f32.mrb[19].mxu0 }
 0x806   :  { %v527_v37 = vmul.f32 1.442695, %v639_v34  ;;  %v640_v39 = vmul.f32 -1.702, %v520_v17 }
 0x808   :  { %779 = vpow2.f32 %v527_v37  ;;  %v529_v40 = vmul.f32 1.442695, %v640_v39 }
 0x80a   :  { %781 = vpow2.f32 %v529_v40 }
 0x812   :  { %v780_v41 = vpop.eup %779 }
 0x813   :  { %v531_v42 = vadd.f32 1.0, %v780_v41 }
 0x814   :  { %v782_v43 = vpop.eup %781 }
 0x815   :  { %783 = vrcp.f32 %v531_v42  ;;  %v532_v44 = vadd.f32 1.0, %v782_v43 }
 0x817   :  { %785 = vrcp.f32 %v532_v44 }
 0x81f   :  { %v784_v0 = vpop.eup %783 }
 0x820   :  { %v537_v46 = vmul.f32 %v784_v0, %v517_v31 }
 0x821   :  { %v786_v45 = vpop.eup %785 }
 0x822   :  { %v538_v1 = vmul.f32 %v786_v45, %v520_v17 }
 0x824   :  { %v556_v47 = vpack.c.bf16 %v538_v1, %v537_v46 }
 0x826   :  { %752 = vmatmul.mubr.bf16.vlgmr.msra.gmra.mrb[4].mxu1 %v556_v47 }
 0x8f9   :  { %v603_v50 = vpop.f32.mrb[4].mxu1 }
 0x8fa   :  { %v604_v52 = vadd.f32 %v641_v49, %v603_v50  ;;  %v753_v53 = vpop.f32.mrb[5].mxu1 }
 0x8fb   :  { %v606_v54 = vpop.f32.mrb[6].mxu1 }
 0x8fc   :  { %v610_v55 = vadd.f32 %v604_v52, %v1030_v35  ;;  %v607_v56 = vadd.f32 %v641_v49, %v606_v54  ;;  %v754_v57 = vpop.f32.mrb[7].mxu1 }
 0x8fe   :  { %612 = vst.msk [vmem:[#allocation2] sm:$0xff] %vm15_vm0, %v610_v55  ;;  %v611_v58 = vadd.f32 %v607_v56, %v1033_v38 }
 0x900   :  { %613 = vst.msk [vmem:[#allocation2 + $0x8] sm:$0xff] %vm15_vm0, %v611_v58 }
 0x901   :  { %798 = shalt.err (!%p795_p4)
}
 0x902   :  { %s799_s16 = scalar_lea.hbm %s1136_s2, 256 }
 0x903   :  { %p800_p5 = scmp.ne.s32.totalorder %s1136_s2, %s799_s16  ;;  %p803_p6 = scmp.lt.u32.totalorder %s799_s16, %s1136_s2 }
 0x905   :  { %p805_p7 = pnand %p803_p6, %p800_p5 }
 0x907   :  { %808 = shalt.err (!%p805_p7)
}
 0x908   :  { %s817_s21 = smov 128   ;;  %s818_s22 = smov 8  }
 0x909   :  { %625 = dma.vmem_to_hbm [thread:$0]  %s620_s13, 256, %s1136_s2, [#allocation3], %s817_s21, %s817_s21, %s818_s22  }
 0x90a   :  { %809 = dma.done.wait [#allocation3], 256  }
 0x90b   :  { %810 = vsyncadd [#allocation3], 4294967040 }
 0x90c   :  { %629 = vsyncpa [#allocation3], 1 }

</bundles_post_ra>
